<compile_context>
chip_gen: v5e
topology: v5e:2x2
jax: 0.10.0
libtpu: 0.0.40
codegen_flags: <defaults>
</compile_context>

<pallas_src>
import functools

import jax
import jax.numpy as jnp
from jax.experimental import pallas as pl
from jax.experimental.pallas import tpu as pltpu

_LANE = 128          # TPU lane width
_SUBLANE = 8         # TPU sublane count (f32)
_NEG = -1e30         # bias for padded logit lanes: never wins max, exp -> 0
_SPLIT_ROWS = 256    # min (sublane-rounded) batch before splitting into >=2 steps


def _round_up(n, m):
    return ((n + m - 1) // m) * m


def _choose_batch_tile(batch, block_b):
    """Rows per grid step.

    Large tile for HBM streaming efficiency (per-step overhead ~0.35us), but
    when the batch is large enough cap the tile at ~half the rows so the grid
    has at least two steps and the "parallel" batch axis can actually shard
    across the two v7x TensorCores (neutral on v5e/v6e).
    """
    bp8 = _round_up(max(batch, 1), _SUBLANE)
    tb = min(block_b, bp8)
    if tb == bp8 and bp8 >= _SPLIT_ROWS:
        tb = _round_up((bp8 + 1) // 2, _SUBLANE)
    return tb


def _discriminator_kernel(x_ref, w_ref, b_ref, out_ref):
    # Single fused affine on the MXU: (TB, H) @ (H, Tp) -> f32 accumulate.
    logits = jnp.dot(x_ref[...], w_ref[...],
                     preferred_element_type=jnp.float32) + b_ref[...]
    # log_softmax over the lane-dense Tp=128 axis. Padded lanes carry a -1e30
    # bias so they never win the max and their exp underflows to exactly 0.
    m = jnp.max(logits, axis=-1, keepdims=True)
    shifted = logits - m
    lse = jnp.log(jnp.sum(jnp.exp(shifted), axis=-1, keepdims=True))
    # Compact store: only the T real task lanes ever hit HBM.
    t = out_ref.shape[-1]
    out_ref[...] = (shifted[:, :t] - lse).astype(out_ref.dtype)


def fuse_discriminator_params(w1, b1, w2, b2, *, compute_dtype=jnp.float32):
    """One-time (init-time) algebraic fusion + lane padding of the weights.

    No nonlinearity sits between the two Linears, so
        (x@W1 + b1)@W2 + b2 == x @ (W1@W2) + (b1@W2 + b2).

    Args (transposed "x @ W" layout, i.e. PyTorch weight.T):
      w1: (H, H), b1: (H,), w2: (H, T), b2: (T,)
    Returns:
      w_p: (H, Tp) in `compute_dtype`  (Tp = T rounded up to 128 lanes; padded
           columns are zero)
      b_p: (1, Tp) f32, padded lanes set to -1e30
    """
    H, T = w2.shape
    Tp = _round_up(T, _LANE)
    w_fused = jnp.dot(w1, w2, preferred_element_type=jnp.float32)            # (H, T)
    b_fused = (jnp.dot(b1[None, :], w2, preferred_element_type=jnp.float32)
               + b2[None, :])                                                # (1, T)
    w_p = jnp.zeros((H, Tp), compute_dtype).at[:, :T].set(
        w_fused.astype(compute_dtype))
    b_p = jnp.full((1, Tp), _NEG, jnp.float32).at[:, :T].set(
        b_fused.astype(jnp.float32))
    return w_p, b_p


@functools.partial(jax.jit, static_argnames=("num_tasks", "block_b"))
def discriminator_forward(x, w_p, b_p, *, num_tasks, block_b=1024):
    """x: (B, H) unpadded (dtype should match w_p's compute dtype).
    Returns (B, num_tasks) f32 log-probabilities."""
    B, H = x.shape
    Tp = w_p.shape[1]
    TB = _choose_batch_tile(B, block_b)
    grid = (pl.cdiv(B, TB),)   # tail block masked by Pallas; no batch padding

    return pl.pallas_call(
        _discriminator_kernel,
        out_shape=jax.ShapeDtypeStruct((B, num_tasks), jnp.float32),
        grid=grid,
        in_specs=[
            # x streams over the batch; H == full array dim -> no K padding.
            pl.BlockSpec((TB, H), lambda i: (i, 0)),
            # Fused weight / bias pinned to block (0,0): VMEM-resident, DMA'd once.
            pl.BlockSpec((H, Tp), lambda i: (0, 0)),
            pl.BlockSpec((1, Tp), lambda i: (0, 0)),
        ],
        # Compact (B, T) output: last dim == full array dim, no padded lanes in HBM.
        out_specs=pl.BlockSpec((TB, num_tasks), lambda i: (i, 0)),
        compiler_params=pltpu.CompilerParams(
            dimension_semantics=("parallel",)),   # megacore-shardable on v7x
    )(x, w_p, b_p)


def _reference(x, w1, b1, w2, b2):
    h = x @ w1 + b1
    logits = h @ w2 + b2
    return jax.nn.log_softmax(logits, axis=1)


if __name__ == "__main__":
    # Shapes consistent with the module:
    #   args.nhid = 32, bidirection=True -> num_directions = 2 -> H = 64
    #   num_tasks = 4, batch = 8
    nhid = 32
    num_directions = 2
    H = nhid * num_directions
    num_tasks = 4
    batch = 8

    key = jax.random.PRNGKey(0)
    kx, kw1, kb1, kw2, kb2 = jax.random.split(key, 5)

    x = jax.random.normal(kx, (batch, H), dtype=jnp.float32)

    # PyTorch Linear stores (out, in); we keep the transposed (in, out) layout
    # so the kernel does plain x @ W.
    bound = 1.0 / jnp.sqrt(H)
    w1 = jax.random.uniform(kw1, (H, H), minval=-bound, maxval=bound,
                            dtype=jnp.float32)
    b1 = jax.random.uniform(kb1, (H,), minval=-bound, maxval=bound,
                            dtype=jnp.float32)
    w2 = jax.random.uniform(kw2, (H, num_tasks), minval=-bound, maxval=bound,
                            dtype=jnp.float32)
    b2 = jax.random.uniform(kb2, (num_tasks,), minval=-bound, maxval=bound,
                            dtype=jnp.float32)

    ref = _reference(x, w1, b1, w2, b2)

    # --- f32 path (default): module semantics, tight tolerance --------------
    w_p, b_p = fuse_discriminator_params(w1, b1, w2, b2)     # once, at init
    out = discriminator_forward(x, w_p, b_p, num_tasks=num_tasks)
    out = jax.block_until_ready(out)
    assert out.shape == (batch, num_tasks)
    assert jnp.allclose(out, ref, atol=1e-4, rtol=1e-4), "f32 mismatch vs reference"

    # --- bf16 path: only when x already arrives in bf16 from upstream -------
    w_bf, b_bf = fuse_discriminator_params(w1, b1, w2, b2,
                                           compute_dtype=jnp.bfloat16)
    out_bf16 = discriminator_forward(x.astype(jnp.bfloat16), w_bf, b_bf,
                                     num_tasks=num_tasks)
    out_bf16 = jax.block_until_ready(out_bf16)
    assert jnp.allclose(out_bf16, ref, atol=5e-2, rtol=5e-2), "bf16 mismatch vs reference"

    # --- larger ragged batch: exercises tail-block masking and the >=2-step
    #     grid split (megacore path); still tiny data. ------------------------
    B2 = 300
    x2 = jax.random.normal(kx, (B2, H), dtype=jnp.float32)
    out2 = discriminator_forward(x2, w_p, b_p, num_tasks=num_tasks)
    out2 = jax.block_until_ready(out2)
    ref2 = _reference(x2, w1, b1, w2, b2)
    assert out2.shape == (B2, num_tasks)
    assert jnp.allclose(out2, ref2, atol=1e-4, rtol=1e-4), "ragged-batch mismatch"

    print("KERNEL_OK")
</pallas_src>

<mosaic_0001>
module attributes {stable_mosaic.version = 11 : i64} {
  func.func @_discriminator_kernel(%arg0: i32, %arg1: memref<8x64xf32, #tpu.memory_space<vmem>>, %arg2: memref<64x128xf32, #tpu.memory_space<vmem>>, %arg3: memref<1x128xf32, #tpu.memory_space<vmem>>, %arg4: memref<8x4xf32, #tpu.memory_space<vmem>>) attributes {dimension_semantics = [#tpu.dimension_semantics<parallel>], iteration_bounds = array<i64: 1>, scalar_prefetch = 0 : i64, scratch_operands = 0 : i64, tpu.core_type = #tpu.core_type<tc>, window_params = [{transform_indices = @transform_0, window_bounds = array<i64: 8, 64>}, {pipeline_mode = #tpu.pipeline_mode<synchronous>, transform_indices = @transform_1, window_bounds = array<i64: 64, 128>}, {pipeline_mode = #tpu.pipeline_mode<synchronous>, transform_indices = @transform_2, window_bounds = array<i64: 1, 128>}, {transform_indices = @transform_3, window_bounds = array<i64: 8, 4>}]} {
    %c0 = arith.constant 0 : index
    %c0_0 = arith.constant 0 : index
    %0 = vector.load %arg1[%c0, %c0_0] : memref<8x64xf32, #tpu.memory_space<vmem>>, vector<8x64xf32>
    %c0_1 = arith.constant 0 : index
    %c0_2 = arith.constant 0 : index
    %1 = vector.load %arg2[%c0_1, %c0_2] : memref<64x128xf32, #tpu.memory_space<vmem>>, vector<64x128xf32>
    %cst = arith.constant dense<0.000000e+00> : vector<8x128xf32>
    %2 = tpu.matmul %0, %1, %cst {dimension_numbers = #tpu.dot_dimension_numbers<[1], [0], [0], [1], [0, 0, 1, 1], [], []>} : vector<8x64xf32>, vector<64x128xf32>, vector<8x128xf32> -> vector<8x128xf32>
    %c0_3 = arith.constant 0 : index
    %c0_4 = arith.constant 0 : index
    %3 = vector.load %arg3[%c0_3, %c0_4] : memref<1x128xf32, #tpu.memory_space<vmem>>, vector<1x128xf32>
    %4 = vector.broadcast %3 : vector<1x128xf32> to vector<8x128xf32>
    %5 = arith.addf %2, %4 : vector<8x128xf32>
    %cst_5 = arith.constant dense<0xFF800000> : vector<8xf32>
    %6 = vector.multi_reduction <maximumf>, %5, %cst_5 [1] : vector<8x128xf32> to vector<8xf32>
    %7 = vector.shape_cast %6 : vector<8xf32> to vector<8x1xf32>
    %8 = vector.broadcast %7 : vector<8x1xf32> to vector<8x128xf32>
    %9 = arith.subf %5, %8 : vector<8x128xf32>
    %10 = math.exp %9 : vector<8x128xf32>
    %cst_6 = arith.constant dense<0.000000e+00> : vector<8xf32>
    %11 = vector.multi_reduction <add>, %10, %cst_6 [1] : vector<8x128xf32> to vector<8xf32>
    %12 = vector.shape_cast %11 : vector<8xf32> to vector<8x1xf32>
    %13 = math.log %12 : vector<8x1xf32>
    %14 = vector.extract_strided_slice %9 {offsets = [0, 0], sizes = [8, 4], strides = [1, 1]} : vector<8x128xf32> to vector<8x4xf32>
    %15 = vector.broadcast %13 : vector<8x1xf32> to vector<8x4xf32>
    %16 = arith.subf %14, %15 : vector<8x4xf32>
    %c0_7 = arith.constant 0 : index
    %c0_8 = arith.constant 0 : index
    %17 = vector.load %arg4[%c0_7, %c0_8] : memref<8x4xf32, #tpu.memory_space<vmem>>, vector<8x4xf32>
    tpu.vector_store %arg4[%c0_7, %c0_8], %16 {strides = array<i32>} : memref<8x4xf32, #tpu.memory_space<vmem>>, vector<8x4xf32>,
    return
  }
  func.func @transform_0(%arg0: i32) -> (i32, i32) {
    %c0_i32 = arith.constant 0 : i32
    %c0_i32_0 = arith.constant 0 : i32
    return %arg0, %c0_i32 : i32, i32
  }
  func.func @transform_1(%arg0: i32) -> (i32, i32) {
    %c0_i32 = arith.constant 0 : i32
    %c0_i32_0 = arith.constant 0 : i32
    %c0_i32_1 = arith.constant 0 : i32
    return %c0_i32, %c0_i32_0 : i32, i32
  }
  func.func @transform_2(%arg0: i32) -> (i32, i32) {
    %c0_i32 = arith.constant 0 : i32
    %c0_i32_0 = arith.constant 0 : i32
    %c0_i32_1 = arith.constant 0 : i32
    return %c0_i32, %c0_i32_0 : i32, i32
  }
  func.func @transform_3(%arg0: i32) -> (i32, i32) {
    %c0_i32 = arith.constant 0 : i32
    %c0_i32_0 = arith.constant 0 : i32
    return %arg0, %c0_i32 : i32, i32
  }
}

</mosaic_0001>

<bundles_post_ra>
// kernel: discriminator_forward.1
= control target key start
LH: loop header
LB: loop body
LE: loop exit
PB: predicated region body
PF: predicated region fallthrough
CT: control target
= control target key end

     0   :  { %8 = vsyncpa [#allocation3], 0  ;;  %s197_s0 = inlined_call_operand.hbm [shape: f32[8,64], index: 0, kind: input, shape index: {}]   ;;  %s198_s1 = inlined_call_operand.hbm [shape: f32[64,128], index: 1, kind: input, shape index: {}]   ;;  %s199_s2 = inlined_call_operand.vmem [shape: f32[1,128], index: 2, kind: input, shape index: {}]   ;;  %s200_s3 = inlined_call_operand.vmem [shape: f32[8,4], index: 3, kind: output, shape index: {}]  }
   0x1   :  { %s15_s14 = sshll.u32 %s197_s0, 4  ;;  %s16_s14 = int_to_ptr.hbm [resolvable:$true] %s15_s14 }
   0x2   :  { %9 = vsyncpa [#allocation5], 0  ;;  %s161_s15 = smov [#allocation2]   ;;  %s25_s19 = sshll.u32 %s198_s1, 4  ;;  %s26_s19 = int_to_ptr.hbm [resolvable:$true] %s25_s19 }
   0x3   :  { %s17_s16 = sshll.u32 %s161_s15, 4  ;;  %s162_s20 = smov [#allocation4]   ;;  %s18_s16 = int_to_ptr.vmem [resolvable:$true] %s17_s16 }
   0x4   :  { %20 = dma.hbm_to_vmem [thread:$0]  %s16_s14, 128, %s18_s16, [#allocation3]  }
   0x5   :  { %s27_s21 = sshll.u32 %s162_s20, 4  ;;  %s163_s22 = smov 128   ;;  %s28_s21 = int_to_ptr.vmem [resolvable:$true] %s27_s21 }
   0x6   :  { %s164_s23 = smov 8  }
   0x7   :  { %33 = dma.hbm_to_vmem [thread:$0]  %s26_s19, 1024, %s28_s21, [#allocation5], %s163_s22, %s163_s22, %s164_s23  }
   0x8   :  { %157 = dma.done.wait [#allocation3], 128  }
   0x9   :  { %158 = vsyncadd [#allocation3], 4294967168 }
   0xa   :  { %159 = dma.done.wait [#allocation5], 1024  }
   0xb   :  { %160 = vsyncadd [#allocation5], 4294966272  ;;  %v52_v0 = vld [vmem:[#allocation4 + $0x38] sm:$0xff]  ;;  %v51_v1 = vld [vmem:[#allocation4 + $0x30] sm:$0xff]  ;;  %vm57_vm0 = vcmask 523264   ;;  %vm91_vm1 = vcmask 31744  }
   0xc   :  { %69 = vmatpush.msra.mxu0 %v52_v0  ;;  %v50_v2 = vld [vmem:[#allocation4 + $0x28] sm:$0xff]  ;;  %v49_v3 = vld [vmem:[#allocation4 + $0x20] sm:$0xff]  ;;  %v48_v4 = vld [vmem:[#allocation4 + $0x18] sm:$0xff] }
   0xd   :  { %v47_v5 = vld [vmem:[#allocation4 + $0x10] sm:$0xff]  ;;  %v46_v6 = vld [vmem:[#allocation4 + $0x8] sm:$0xff]  ;;  %v45_v7 = vld [vmem:[#allocation4] sm:$0xff] }
   0xe   :  { %70 = vmatpush.msra.mxu0 %v51_v1  ;;  %v44_v8 = vld [vmem:[#allocation2] sm:$0xff] }
   0xf   :  { %v104_v9 = vld [vmem:[%s199_s2] ss:$0 sm:$0xff] }
  0x10   :  { %71 = vmatpush.msra.mxu0 %v50_v2 }
  0x12   :  { %72 = vmatpush.msra.mxu0 %v49_v3 }
  0x14   :  { %73 = vmatpush.msra.mxu0 %v48_v4 }
  0x16   :  { %74 = vmatpush.msra.mxu0 %v47_v5 }
  0x18   :  { %75 = vmatpush.msra.mxu0 %v46_v6 }
  0x1a   :  { %76 = vmatpush.msra.mxu0 %v45_v7 }
  0x1b   :  { %99 = vmatmul.msk.f32.vlgmr.msra.gmra.mxu0 %vm57_vm0, %v44_v8 }
  0x98   :  { %v78_v10 = vpop.f32.mrf.mxu0 }
  0x99   :  { %v79_v11 = vadd.f32 %v104_v9, %v78_v10 }
  0x9b   :  { %81 = vmax.xlane.f32.xlu0 %v79_v11 }
 0x10e   :  { %v82_v12 = vpop.xlane.xlu0 %81 }
 0x10f   :  { %v83_v13 = vsub.f32 %v79_v11, %v82_v12 }
 0x111   :  { %v84_v14 = vmul.f32 1.442695, %v83_v13 }
 0x113   :  { %105 = vpow2.f32 %v84_v14 }
 0x119   :  { %v106_v15 = vpop.eup %105 }
 0x11a   :  { %86 = vadd.xlane.f32.xlu0 %v106_v15 }
 0x18d   :  { %v87_v16 = vpop.xlane.xlu0 %86 }
 0x18e   :  { %107 = vlog2.f32 %v87_v16 }
 0x194   :  { %v108_v17 = vpop.eup %107 }
 0x195   :  { %v89_v18 = vmul.f32 0.6931472, %v108_v17 }
 0x197   :  { %v90_v19 = vsub.f32 %v83_v13, %v89_v18 }
 0x199   :  { %92 = vst.msk [vmem:[%s200_s3] sm:$0xff] %vm91_vm1, %v90_v19 }
 0x19a   :  { %97 = vsyncpa [#allocation3], 1 }
 0x19b   :  { %98 = vsyncpa [#allocation5], 1 }

</bundles_post_ra>
